<compile_context>
chip_gen: v7x
topology: tpu7x:2x2x1
jax: 0.10.0
libtpu: 0.0.40
codegen_flags: <defaults>
</compile_context>

<pallas_src>
import functools

import jax
import jax.numpy as jnp
from jax import lax
from jax.experimental import pallas as pl
from jax.experimental.pallas import tpu as pltpu

EPS = 1e-5


def _vmem_capacity_bytes() -> int:
    """Physical VMEM per TensorCore (128 MiB v5e/v6e, 64 MiB v7x)."""
    try:
        return int(pltpu.get_tpu_info().vmem_capacity_bytes)
    except Exception:
        return 64 << 20  # conservative default (v7x per-TC size)


def _plan_tiles(n, c, hw_pad, itemsize, usable_bytes):
    """Pick (bn, thw) so a block is ~0.5-1 MiB (HBM-roofline sweet spot),
    lane-aligned, and small enough that 4 double-buffers fit the budget."""
    target = min(1 << 20, max(usable_bytes // 8, 128 * 8 * itemsize))
    k = hw_pad // 128
    thw = 128
    for d in range(1, k + 1):
        if k % d == 0 and c * 128 * d * itemsize <= target:
            thw = 128 * d
    bn = 1  # sample-blocking so tiny-C tiles aren't overhead-dominated
    while bn < 8 and n % (bn * 2) == 0 and (bn * 2) * c * thw * itemsize <= target:
        bn *= 2
    return bn, thw


def _residual_kernel(x_ref, w_ref, b_ref, g_ref, bt_ref, o_ref,
                     sum_ref, sq_ref, scale_ref, shift_ref, cache_ref,
                     *, inv_p, hw_valid, use_cache, need_mask):
    # x_ref:  (BN, C, THW) tile, channels on sublanes, pixels on lanes
    # w_ref:  (C, C) conv weight (out_ch, in_ch) -- consumed as-is
    # b_ref, g_ref, bt_ref: (C, 1) f32 conv bias / BN gamma / BN beta
    # o_ref:  (BN, C, THW)
    # sum/sq/scale/shift_ref: (C, 1) f32 persistent scratch
    # cache_ref: (n_blocks, BN, C, THW) persistent x cache (dummy if unused)
    phase = pl.program_id(0)
    blk = pl.program_id(1) * pl.num_programs(2) + pl.program_id(2)

    @pl.when((phase == 0) & (blk == 0))
    def _():
        sum_ref[...] = jnp.zeros_like(sum_ref)
        sq_ref[...] = jnp.zeros_like(sq_ref)

    if use_cache:
        # Phase 0: stash the freshly DMA'd tile; phase 1: the x BlockSpec is
        # pinned (no HBM re-read) and we serve the tile from this cache.
        @pl.when(phase == 0)
        def _():
            cache_ref[blk] = x_ref[...]
        x_in = cache_ref[blk]
    else:
        x_in = x_ref[...]

    bn, c, thw = x_in.shape
    w = w_ref[...]
    bias = b_ref[...]                                     # (C, 1) f32

    # 1x1 conv per sample: per-pixel channel mix on the MXU (recomputed in
    # phase 1; conv FLOPs are negligible, the op is HBM-bound).
    pairs = []
    for s in range(bn):                                   # static unroll, bn <= 8
        x_s = x_in[s]                                     # (C, THW)
        y_s = jnp.dot(w, x_s, preferred_element_type=jnp.float32) + bias
        pairs.append((x_s, y_s))

    @pl.when(phase == 0)
    def _():
        # Accumulate BN batch statistics (reduction over N,H,W per channel),
        # masking out HW padding (padded pixels would contribute y = bias).
        if need_mask:
            pos = pl.program_id(2) * thw + lax.broadcasted_iota(
                jnp.int32, (c, thw), 1)
            valid = pos < hw_valid
        s_acc = jnp.zeros((c, 1), jnp.float32)
        q_acc = jnp.zeros((c, 1), jnp.float32)
        for _, y_s in pairs:
            y_m = jnp.where(valid, y_s, 0.0) if need_mask else y_s
            s_acc = s_acc + jnp.sum(y_m, axis=-1, keepdims=True)
            q_acc = q_acc + jnp.sum(y_m * y_m, axis=-1, keepdims=True)
        sum_ref[...] += s_acc
        sq_ref[...] += q_acc

    @pl.when((phase == 1) & (blk == 0))
    def _():
        # Hoisted: compute BN scale/shift once for all phase-1 tiles.
        mean = sum_ref[...] * inv_p
        var = jnp.maximum(sq_ref[...] * inv_p - mean * mean, 0.0)  # clamp cancellation
        scale = g_ref[...] * lax.rsqrt(var + EPS)
        scale_ref[...] = scale
        shift_ref[...] = bt_ref[...] - mean * scale

    @pl.when(phase == 1)
    def _():
        scale = scale_ref[...]
        shift = shift_ref[...]
        for s, (x_s, y_s) in enumerate(pairs):
            out = y_s * scale + shift + x_s.astype(jnp.float32)   # BN + residual
            o_ref[s] = jnp.maximum(out, 0.0).astype(o_ref.dtype)  # ReLU


def residual_connection(x_nchw, w, b, gamma, beta):
    """x_nchw: (N, C, H, W); w: (C, C) 1x1 conv weight; b/gamma/beta: (C,)."""
    n, c, h, wdt = x_nchw.shape
    hw = h * wdt
    dtype = x_nchw.dtype
    itemsize = jnp.dtype(dtype).itemsize

    # Pad HW to a lane multiple so stores are unmasked / lane-dense.
    hw_pad = pl.cdiv(hw, 128) * 128
    need_pad = hw_pad != hw

    # VMEM budget, derived from the chip (halved automatically on v7x).
    phys = _vmem_capacity_bytes()
    vmem_limit = (phys * 3) // 4          # leave headroom below physical
    usable = (vmem_limit * 3) // 4        # our own planning budget

    bn, thw = _plan_tiles(n, c, hw_pad, itemsize, usable)
    n_i = n // bn
    n_t = hw_pad // thw
    n_blk = n_i * n_t
    block_bytes = bn * c * thw * itemsize

    # 2 in + 2 out double-buffers + resident weight/params/scratch + cache.
    fixed_bytes = 2 * c * c * itemsize + 6 * c * itemsize + 16 * c * 4 + (64 << 10)
    cache_bytes = n * c * hw_pad * itemsize
    use_cache = cache_bytes + 4 * block_bytes + fixed_bytes <= usable

    # Free reshape: NCHW is contiguous as (N, C, H*W).
    x3 = x_nchw.reshape(n, c, hw)
    if need_pad:
        x3 = jnp.pad(x3, ((0, 0), (0, 0), (0, hw_pad - hw)))

    kernel = functools.partial(
        _residual_kernel,
        inv_p=1.0 / float(n * hw),        # true pixel count, excludes padding
        hw_valid=hw,
        use_cache=use_cache,
        need_mask=need_pad,
    )

    if use_cache:
        # Phase 1 pins x at block (0,0,0): no new DMAs, tiles come from the cache.
        x_index = lambda ph, i, t: ((1 - ph) * i, 0, (1 - ph) * t)
        cache_shape = (n_blk, bn, c, thw)
    else:
        x_index = lambda ph, i, t: (i, 0, t)
        cache_shape = (1, 1, 8, 128)      # unused dummy scratch

    x_spec = pl.BlockSpec((bn, c, thw), x_index)
    # Phase 0 pins the output block at (0,0,0); it is never written there and
    # the first phase-1 step fully overwrites the resident buffer before any
    # writeback, so no garbage tiles reach HBM (documented reliance on Pallas
    # writing output blocks back only on block-index change).
    out_spec = pl.BlockSpec((bn, c, thw), lambda ph, i, t: (ph * i, 0, ph * t))
    param_spec = pl.BlockSpec((c, 1), lambda ph, i, t: (0, 0))
    w_spec = pl.BlockSpec((c, c), lambda ph, i, t: (0, 0))

    out3 = pl.pallas_call(
        kernel,
        out_shape=jax.ShapeDtypeStruct((n, c, hw_pad), dtype),
        grid=(2, n_i, n_t),
        in_specs=[x_spec, w_spec, param_spec, param_spec, param_spec],
        out_specs=out_spec,
        scratch_shapes=[
            pltpu.VMEM((c, 1), jnp.float32),   # per-channel sum
            pltpu.VMEM((c, 1), jnp.float32),   # per-channel sum of squares
            pltpu.VMEM((c, 1), jnp.float32),   # BN scale (hoisted)
            pltpu.VMEM((c, 1), jnp.float32),   # BN shift (hoisted)
            pltpu.VMEM(cache_shape, dtype),    # activation cache (or dummy)
        ],
        compiler_params=pltpu.CompilerParams(
            # All axes sequential: stats scratch is a cross-tile accumulator.
            dimension_semantics=("arbitrary", "arbitrary", "arbitrary"),
            vmem_limit_bytes=int(vmem_limit),
        ),
    )(x3, w.astype(dtype),
      b.reshape(c, 1).astype(jnp.float32),
      gamma.reshape(c, 1).astype(jnp.float32),
      beta.reshape(c, 1).astype(jnp.float32))

    if need_pad:
        out3 = out3[:, :, :hw]
    return out3.reshape(n, c, h, wdt)


if __name__ == "__main__":
    # Small shapes consistent with the module (residual add requires
    # in_channels == out_channels).
    N, C, H, W = 2, 4, 16, 16

    key = jax.random.PRNGKey(0)
    kx, kw, kb, kg, kbt = jax.random.split(key, 5)

    x = jax.random.normal(kx, (N, C, H, W), dtype=jnp.float32)

    # Deterministic synthetic parameters (Conv2d 1x1 weight/bias, BN gamma/beta).
    fan_in = C  # 1x1 kernel
    bound = 1.0 / (fan_in ** 0.5)
    w = jax.random.uniform(kw, (C, C), minval=-bound, maxval=bound,
                           dtype=jnp.float32)
    b = jax.random.uniform(kb, (C,), minval=-bound, maxval=bound,
                           dtype=jnp.float32)
    gamma = 1.0 + 0.1 * jax.random.normal(kg, (C,), dtype=jnp.float32)
    beta = 0.1 * jax.random.normal(kbt, (C,), dtype=jnp.float32)

    out = residual_connection(x, w, b, gamma, beta)
    out = jax.block_until_ready(out)

    # Lightweight sanity check against a pure-JAX reference.
    y_ref = jnp.einsum("oc,nchw->nohw", w, x) + b[None, :, None, None]
    mean = jnp.mean(y_ref, axis=(0, 2, 3), keepdims=True)
    var = jnp.mean((y_ref - mean) ** 2, axis=(0, 2, 3), keepdims=True)
    y_bn = (y_ref - mean) / jnp.sqrt(var + EPS)
    y_bn = y_bn * gamma[None, :, None, None] + beta[None, :, None, None]
    ref = jnp.maximum(y_bn + x, 0.0)
    assert jnp.allclose(out, ref, atol=1e-4, rtol=1e-4), "mismatch vs reference"

    print("KERNEL_OK")
</pallas_src>

<mosaic_0001>
module attributes {stable_mosaic.version = 11 : i64} {
  func.func @_residual_kernel(%arg0: i32, %arg1: i32, %arg2: i32, %arg3: memref<2x4x256xf32, #tpu.memory_space<vmem>>, %arg4: memref<4x4xf32, #tpu.memory_space<vmem>>, %arg5: memref<4x1xf32, #tpu.memory_space<vmem>>, %arg6: memref<4x1xf32, #tpu.memory_space<vmem>>, %arg7: memref<4x1xf32, #tpu.memory_space<vmem>>, %arg8: memref<2x4x256xf32, #tpu.memory_space<vmem>>, %arg9: memref<4x1xf32, #tpu.memory_space<vmem>>, %arg10: memref<4x1xf32, #tpu.memory_space<vmem>>, %arg11: memref<4x1xf32, #tpu.memory_space<vmem>>, %arg12: memref<4x1xf32, #tpu.memory_space<vmem>>, %arg13: memref<1x2x4x256xf32, #tpu.memory_space<vmem>>) attributes {dimension_semantics = [#tpu.dimension_semantics<arbitrary>, #tpu.dimension_semantics<arbitrary>, #tpu.dimension_semantics<arbitrary>], iteration_bounds = array<i64: 2, 1, 1>, scalar_prefetch = 0 : i64, scratch_operands = 5 : i64, tpu.core_type = #tpu.core_type<tc>, window_params = [{transform_indices = @transform_0, window_bounds = array<i64: 2, 4, 256>}, {pipeline_mode = #tpu.pipeline_mode<synchronous>, transform_indices = @transform_1, window_bounds = array<i64: 4, 4>}, {pipeline_mode = #tpu.pipeline_mode<synchronous>, transform_indices = @transform_2, window_bounds = array<i64: 4, 1>}, {pipeline_mode = #tpu.pipeline_mode<synchronous>, transform_indices = @transform_3, window_bounds = array<i64: 4, 1>}, {pipeline_mode = #tpu.pipeline_mode<synchronous>, transform_indices = @transform_4, window_bounds = array<i64: 4, 1>}, {transform_indices = @transform_5, window_bounds = array<i64: 2, 4, 256>}]} {
    %c1_i32 = arith.constant 1 : i32
    %0 = arith.muli %arg1, %c1_i32 : i32
    %1 = arith.addi %0, %arg2 : i32
    %c0_i32 = arith.constant 0 : i32
    %2 = arith.cmpi eq, %arg0, %c0_i32 : i32
    %c0_i32_0 = arith.constant 0 : i32
    %3 = arith.cmpi eq, %1, %c0_i32_0 : i32
    %4 = arith.andi %2, %3 : i1
    %5 = arith.extui %4 : i1 to i32
    %c0_i32_1 = arith.constant 0 : i32
    %6 = arith.cmpi ne, %5, %c0_i32_1 : i32
    scf.if %6 {
      %cst_18 = arith.constant 0.000000e+00 : f32
      %36 = vector.broadcast %cst_18 : f32 to vector<4x1xf32>
      %c0_19 = arith.constant 0 : index
      %c0_20 = arith.constant 0 : index
      %37 = vector.load %arg9[%c0_19, %c0_20] : memref<4x1xf32, #tpu.memory_space<vmem>>, vector<4x1xf32>
      tpu.vector_store %arg9[%c0_19, %c0_20], %36 {strides = array<i32>} : memref<4x1xf32, #tpu.memory_space<vmem>>, vector<4x1xf32>,
      %cst_21 = arith.constant 0.000000e+00 : f32
      %38 = vector.broadcast %cst_21 : f32 to vector<4x1xf32>
      %c0_22 = arith.constant 0 : index
      %c0_23 = arith.constant 0 : index
      %39 = vector.load %arg10[%c0_22, %c0_23] : memref<4x1xf32, #tpu.memory_space<vmem>>, vector<4x1xf32>
      tpu.vector_store %arg10[%c0_22, %c0_23], %38 {strides = array<i32>} : memref<4x1xf32, #tpu.memory_space<vmem>>, vector<4x1xf32>,
    } else {
    }
    %c0_i32_2 = arith.constant 0 : i32
    %7 = arith.cmpi eq, %arg0, %c0_i32_2 : i32
    %8 = arith.extui %7 : i1 to i32
    %c0_i32_3 = arith.constant 0 : i32
    %9 = arith.cmpi ne, %8, %c0_i32_3 : i32
    scf.if %9 {
      %c0_18 = arith.constant 0 : index
      %c0_19 = arith.constant 0 : index
      %c0_20 = arith.constant 0 : index
      %36 = vector.load %arg3[%c0_18, %c0_19, %c0_20] : memref<2x4x256xf32, #tpu.memory_space<vmem>>, vector<2x4x256xf32>
      %37 = arith.index_cast %1 : i32 to index
      %c0_21 = arith.constant 0 : index
      %c0_22 = arith.constant 0 : index
      %c0_23 = arith.constant 0 : index
      %38 = vector.load %arg13[%37, %c0_21, %c0_22, %c0_23] : memref<1x2x4x256xf32, #tpu.memory_space<vmem>>, vector<1x2x4x256xf32>
      %39 = vector.shape_cast %38 : vector<1x2x4x256xf32> to vector<2x4x256xf32>
      %40 = vector.shape_cast %36 : vector<2x4x256xf32> to vector<1x2x4x256xf32>
      tpu.vector_store %arg13[%37, %c0_21, %c0_22, %c0_23], %40 {strides = array<i32>} : memref<1x2x4x256xf32, #tpu.memory_space<vmem>>, vector<1x2x4x256xf32>,
    } else {
    }
    %10 = arith.index_cast %1 : i32 to index
    %c0 = arith.constant 0 : index
    %c0_4 = arith.constant 0 : index
    %c0_5 = arith.constant 0 : index
    %11 = vector.load %arg13[%10, %c0, %c0_4, %c0_5] : memref<1x2x4x256xf32, #tpu.memory_space<vmem>>, vector<1x2x4x256xf32>
    %12 = vector.shape_cast %11 : vector<1x2x4x256xf32> to vector<2x4x256xf32>
    %c0_6 = arith.constant 0 : index
    %c0_7 = arith.constant 0 : index
    %13 = vector.load %arg4[%c0_6, %c0_7] : memref<4x4xf32, #tpu.memory_space<vmem>>, vector<4x4xf32>
    %c0_8 = arith.constant 0 : index
    %c0_9 = arith.constant 0 : index
    %14 = vector.load %arg5[%c0_8, %c0_9] : memref<4x1xf32, #tpu.memory_space<vmem>>, vector<4x1xf32>
    %15 = vector.extract_strided_slice %12 {offsets = [0, 0, 0], sizes = [1, 4, 256], strides = [1, 1, 1]} : vector<2x4x256xf32> to vector<1x4x256xf32>
    %16 = vector.shape_cast %15 : vector<1x4x256xf32> to vector<4x256xf32>
    %cst = arith.constant dense<0.000000e+00> : vector<4x256xf32>
    %17 = tpu.matmul %13, %16, %cst {dimension_numbers = #tpu.dot_dimension_numbers<[1], [0], [0], [1], [0, 0, 1, 1], [], []>} : vector<4x4xf32>, vector<4x256xf32>, vector<4x256xf32> -> vector<4x256xf32>
    %18 = vector.broadcast %14 : vector<4x1xf32> to vector<4x256xf32>
    %19 = arith.addf %17, %18 : vector<4x256xf32>
    %20 = vector.extract_strided_slice %12 {offsets = [1, 0, 0], sizes = [1, 4, 256], strides = [1, 1, 1]} : vector<2x4x256xf32> to vector<1x4x256xf32>
    %21 = vector.shape_cast %20 : vector<1x4x256xf32> to vector<4x256xf32>
    %cst_10 = arith.constant dense<0.000000e+00> : vector<4x256xf32>
    %22 = tpu.matmul %13, %21, %cst_10 {dimension_numbers = #tpu.dot_dimension_numbers<[1], [0], [0], [1], [0, 0, 1, 1], [], []>} : vector<4x4xf32>, vector<4x256xf32>, vector<4x256xf32> -> vector<4x256xf32>
    %23 = vector.broadcast %14 : vector<4x1xf32> to vector<4x256xf32>
    %24 = arith.addf %22, %23 : vector<4x256xf32>
    %c0_i32_11 = arith.constant 0 : i32
    %25 = arith.cmpi eq, %arg0, %c0_i32_11 : i32
    %26 = arith.extui %25 : i1 to i32
    %c0_i32_12 = arith.constant 0 : i32
    %27 = arith.cmpi ne, %26, %c0_i32_12 : i32
    scf.if %27 {
      %cst_18 = arith.constant 0.000000e+00 : f32
      %36 = vector.broadcast %cst_18 : f32 to vector<4x1xf32>
      %cst_19 = arith.constant 0.000000e+00 : f32
      %37 = vector.broadcast %cst_19 : f32 to vector<4x1xf32>
      %cst_20 = arith.constant dense<0.000000e+00> : vector<4xf32>
      %38 = vector.multi_reduction <add>, %19, %cst_20 [1] : vector<4x256xf32> to vector<4xf32>
      %39 = vector.shape_cast %38 : vector<4xf32> to vector<4x1xf32>
      %40 = arith.addf %36, %39 : vector<4x1xf32>
      %41 = arith.mulf %19, %19 : vector<4x256xf32>
      %cst_21 = arith.constant dense<0.000000e+00> : vector<4xf32>
      %42 = vector.multi_reduction <add>, %41, %cst_21 [1] : vector<4x256xf32> to vector<4xf32>
      %43 = vector.shape_cast %42 : vector<4xf32> to vector<4x1xf32>
      %44 = arith.addf %37, %43 : vector<4x1xf32>
      %cst_22 = arith.constant dense<0.000000e+00> : vector<4xf32>
      %45 = vector.multi_reduction <add>, %24, %cst_22 [1] : vector<4x256xf32> to vector<4xf32>
      %46 = vector.shape_cast %45 : vector<4xf32> to vector<4x1xf32>
      %47 = arith.addf %40, %46 : vector<4x1xf32>
      %48 = arith.mulf %24, %24 : vector<4x256xf32>
      %cst_23 = arith.constant dense<0.000000e+00> : vector<4xf32>
      %49 = vector.multi_reduction <add>, %48, %cst_23 [1] : vector<4x256xf32> to vector<4xf32>
      %50 = vector.shape_cast %49 : vector<4xf32> to vector<4x1xf32>
      %51 = arith.addf %44, %50 : vector<4x1xf32>
      %c0_24 = arith.constant 0 : index
      %c0_25 = arith.constant 0 : index
      %52 = vector.load %arg9[%c0_24, %c0_25] : memref<4x1xf32, #tpu.memory_space<vmem>>, vector<4x1xf32>
      %53 = arith.addf %52, %47 : vector<4x1xf32>
      %c0_26 = arith.constant 0 : index
      %c0_27 = arith.constant 0 : index
      %54 = vector.load %arg9[%c0_26, %c0_27] : memref<4x1xf32, #tpu.memory_space<vmem>>, vector<4x1xf32>
      tpu.vector_store %arg9[%c0_26, %c0_27], %53 {strides = array<i32>} : memref<4x1xf32, #tpu.memory_space<vmem>>, vector<4x1xf32>,
      %c0_28 = arith.constant 0 : index
      %c0_29 = arith.constant 0 : index
      %55 = vector.load %arg10[%c0_28, %c0_29] : memref<4x1xf32, #tpu.memory_space<vmem>>, vector<4x1xf32>
      %56 = arith.addf %55, %51 : vector<4x1xf32>
      %c0_30 = arith.constant 0 : index
      %c0_31 = arith.constant 0 : index
      %57 = vector.load %arg10[%c0_30, %c0_31] : memref<4x1xf32, #tpu.memory_space<vmem>>, vector<4x1xf32>
      tpu.vector_store %arg10[%c0_30, %c0_31], %56 {strides = array<i32>} : memref<4x1xf32, #tpu.memory_space<vmem>>, vector<4x1xf32>,
    } else {
    }
    %c1_i32_13 = arith.constant 1 : i32
    %28 = arith.cmpi eq, %arg0, %c1_i32_13 : i32
    %c0_i32_14 = arith.constant 0 : i32
    %29 = arith.cmpi eq, %1, %c0_i32_14 : i32
    %30 = arith.andi %28, %29 : i1
    %31 = arith.extui %30 : i1 to i32
    %c0_i32_15 = arith.constant 0 : i32
    %32 = arith.cmpi ne, %31, %c0_i32_15 : i32
    scf.if %32 {
      %c0_18 = arith.constant 0 : index
      %c0_19 = arith.constant 0 : index
      %36 = vector.load %arg9[%c0_18, %c0_19] : memref<4x1xf32, #tpu.memory_space<vmem>>, vector<4x1xf32>
      %cst_20 = arith.constant 0.001953125 : f32
      %37 = vector.broadcast %cst_20 : f32 to vector<4x1xf32>
      %38 = arith.mulf %36, %37 : vector<4x1xf32>
      %c0_21 = arith.constant 0 : index
      %c0_22 = arith.constant 0 : index
      %39 = vector.load %arg10[%c0_21, %c0_22] : memref<4x1xf32, #tpu.memory_space<vmem>>, vector<4x1xf32>
      %cst_23 = arith.constant 0.001953125 : f32
      %40 = vector.broadcast %cst_23 : f32 to vector<4x1xf32>
      %41 = arith.mulf %39, %40 : vector<4x1xf32>
      %42 = arith.mulf %38, %38 : vector<4x1xf32>
      %43 = arith.subf %41, %42 : vector<4x1xf32>
      %cst_24 = arith.constant 0.000000e+00 : f32
      %44 = vector.broadcast %cst_24 : f32 to vector<4x1xf32>
      %45 = arith.maximumf %43, %44 : vector<4x1xf32>
      %c0_25 = arith.constant 0 : index
      %c0_26 = arith.constant 0 : index
      %46 = vector.load %arg6[%c0_25, %c0_26] : memref<4x1xf32, #tpu.memory_space<vmem>>, vector<4x1xf32>
      %cst_27 = arith.constant 9.99999974E-6 : f32
      %47 = vector.broadcast %cst_27 : f32 to vector<4x1xf32>
      %48 = arith.addf %45, %47 : vector<4x1xf32>
      %49 = math.rsqrt %48 : vector<4x1xf32>
      %50 = arith.mulf %46, %49 : vector<4x1xf32>
      %c0_28 = arith.constant 0 : index
      %c0_29 = arith.constant 0 : index
      %51 = vector.load %arg11[%c0_28, %c0_29] : memref<4x1xf32, #tpu.memory_space<vmem>>, vector<4x1xf32>
      tpu.vector_store %arg11[%c0_28, %c0_29], %50 {strides = array<i32>} : memref<4x1xf32, #tpu.memory_space<vmem>>, vector<4x1xf32>,
      %c0_30 = arith.constant 0 : index
      %c0_31 = arith.constant 0 : index
      %52 = vector.load %arg7[%c0_30, %c0_31] : memref<4x1xf32, #tpu.memory_space<vmem>>, vector<4x1xf32>
      %53 = arith.mulf %38, %50 : vector<4x1xf32>
      %54 = arith.subf %52, %53 : vector<4x1xf32>
      %c0_32 = arith.constant 0 : index
      %c0_33 = arith.constant 0 : index
      %55 = vector.load %arg12[%c0_32, %c0_33] : memref<4x1xf32, #tpu.memory_space<vmem>>, vector<4x1xf32>
      tpu.vector_store %arg12[%c0_32, %c0_33], %54 {strides = array<i32>} : memref<4x1xf32, #tpu.memory_space<vmem>>, vector<4x1xf32>,
    } else {
    }
    %c1_i32_16 = arith.constant 1 : i32
    %33 = arith.cmpi eq, %arg0, %c1_i32_16 : i32
    %34 = arith.extui %33 : i1 to i32
    %c0_i32_17 = arith.constant 0 : i32
    %35 = arith.cmpi ne, %34, %c0_i32_17 : i32
    scf.if %35 {
      %c0_18 = arith.constant 0 : index
      %c0_19 = arith.constant 0 : index
      %36 = vector.load %arg11[%c0_18, %c0_19] : memref<4x1xf32, #tpu.memory_space<vmem>>, vector<4x1xf32>
      %c0_20 = arith.constant 0 : index
      %c0_21 = arith.constant 0 : index
      %37 = vector.load %arg12[%c0_20, %c0_21] : memref<4x1xf32, #tpu.memory_space<vmem>>, vector<4x1xf32>
      %38 = vector.broadcast %36 : vector<4x1xf32> to vector<4x256xf32>
      %39 = arith.mulf %19, %38 : vector<4x256xf32>
      %40 = vector.broadcast %37 : vector<4x1xf32> to vector<4x256xf32>
      %41 = arith.addf %39, %40 : vector<4x256xf32>
      %42 = arith.addf %41, %16 : vector<4x256xf32>
      %cst_22 = arith.constant 0.000000e+00 : f32
      %43 = vector.broadcast %cst_22 : f32 to vector<4x256xf32>
      %44 = arith.maximumf %42, %43 : vector<4x256xf32>
      %c0_23 = arith.constant 0 : index
      %c0_24 = arith.constant 0 : index
      %c0_25 = arith.constant 0 : index
      %45 = vector.load %arg8[%c0_23, %c0_24, %c0_25] : memref<2x4x256xf32, #tpu.memory_space<vmem>>, vector<1x4x256xf32>
      %46 = vector.shape_cast %45 : vector<1x4x256xf32> to vector<4x256xf32>
      %47 = vector.shape_cast %44 : vector<4x256xf32> to vector<1x4x256xf32>
      tpu.vector_store %arg8[%c0_23, %c0_24, %c0_25], %47 {strides = array<i32>} : memref<2x4x256xf32, #tpu.memory_space<vmem>>, vector<1x4x256xf32>,
      %48 = vector.broadcast %36 : vector<4x1xf32> to vector<4x256xf32>
      %49 = arith.mulf %24, %48 : vector<4x256xf32>
      %50 = vector.broadcast %37 : vector<4x1xf32> to vector<4x256xf32>
      %51 = arith.addf %49, %50 : vector<4x256xf32>
      %52 = arith.addf %51, %21 : vector<4x256xf32>
      %cst_26 = arith.constant 0.000000e+00 : f32
      %53 = vector.broadcast %cst_26 : f32 to vector<4x256xf32>
      %54 = arith.maximumf %52, %53 : vector<4x256xf32>
      %c1 = arith.constant 1 : index
      %c0_27 = arith.constant 0 : index
      %c0_28 = arith.constant 0 : index
      %55 = vector.load %arg8[%c1, %c0_27, %c0_28] : memref<2x4x256xf32, #tpu.memory_space<vmem>>, vector<1x4x256xf32>
      %56 = vector.shape_cast %55 : vector<1x4x256xf32> to vector<4x256xf32>
      %57 = vector.shape_cast %54 : vector<4x256xf32> to vector<1x4x256xf32>
      tpu.vector_store %arg8[%c1, %c0_27, %c0_28], %57 {strides = array<i32>} : memref<2x4x256xf32, #tpu.memory_space<vmem>>, vector<1x4x256xf32>,
    } else {
    }
    return
  }
  func.func @transform_0(%arg0: i32, %arg1: i32, %arg2: i32) -> (i32, i32, i32) {
    %c1_i32 = arith.constant 1 : i32
    %0 = arith.subi %c1_i32, %arg0 : i32
    %1 = arith.muli %0, %arg1 : i32
    %c1_i32_0 = arith.constant 1 : i32
    %2 = arith.subi %c1_i32_0, %arg0 : i32
    %3 = arith.muli %2, %arg2 : i32
    %c0_i32 = arith.constant 0 : i32
    %c0_i32_1 = arith.constant 0 : i32
    return %1, %c0_i32, %3 : i32, i32, i32
  }
  func.func @transform_1(%arg0: i32, %arg1: i32, %arg2: i32) -> (i32, i32) {
    %c0_i32 = arith.constant 0 : i32
    %c0_i32_0 = arith.constant 0 : i32
    %c0_i32_1 = arith.constant 0 : i32
    return %c0_i32, %c0_i32_0 : i32, i32
  }
  func.func @transform_2(%arg0: i32, %arg1: i32, %arg2: i32) -> (i32, i32) {
    %c0_i32 = arith.constant 0 : i32
    %c0_i32_0 = arith.constant 0 : i32
    %c0_i32_1 = arith.constant 0 : i32
    return %c0_i32, %c0_i32_0 : i32, i32
  }
  func.func @transform_3(%arg0: i32, %arg1: i32, %arg2: i32) -> (i32, i32) {
    %c0_i32 = arith.constant 0 : i32
    %c0_i32_0 = arith.constant 0 : i32
    %c0_i32_1 = arith.constant 0 : i32
    return %c0_i32, %c0_i32_0 : i32, i32
  }
  func.func @transform_4(%arg0: i32, %arg1: i32, %arg2: i32) -> (i32, i32) {
    %c0_i32 = arith.constant 0 : i32
    %c0_i32_0 = arith.constant 0 : i32
    %c0_i32_1 = arith.constant 0 : i32
    return %c0_i32, %c0_i32_0 : i32, i32
  }
  func.func @transform_5(%arg0: i32, %arg1: i32, %arg2: i32) -> (i32, i32, i32) {
    %0 = arith.muli %arg0, %arg1 : i32
    %1 = arith.muli %arg0, %arg2 : i32
    %c0_i32 = arith.constant 0 : i32
    %c0_i32_0 = arith.constant 0 : i32
    return %0, %c0_i32, %1 : i32, i32, i32
  }
}

</mosaic_0001>

<bundles_post_ra>
// kernel: tpu_custom_call.1
= control target key start
LH: loop header
LB: loop body
LE: loop exit
PB: predicated region body
PF: predicated region fallthrough
CT: control target
= control target key end

     0   :  { %10 = vsyncpa [#allocation8], 0  ;;  %s1076_s0 = inlined_call_operand.hbm [shape: f32[2,4,256], index: 0, kind: input, shape index: {}]   ;;  %s1077_s1 = inlined_call_operand.vmem [shape: f32[4,4], index: 1, kind: input, shape index: {}]   ;;  %s1078_s2 = inlined_call_operand.vmem [shape: f32[4,1], index: 2, kind: input, shape index: {}]   ;;  %s1079_s3 = inlined_call_operand.vmem [shape: f32[4,1], index: 3, kind: input, shape index: {}]   ;;  %s1080_s4 = inlined_call_operand.vmem [shape: f32[4,1], index: 4, kind: input, shape index: {}]   ;;  %s1081_s5 = inlined_call_operand.hbm [shape: f32[2,4,256], index: 5, kind: output, shape index: {}]  }
   0x1   :  { %12 = vsyncpa [#allocation8 + $0x1], 0 }
   0x2   :  { %13 = vsyncpa [#allocation9], 0 }
   0x3   :  { %15 = vsyncpa [#allocation9 + $0x1], 0  ;;  %s914_s18 = smov 0   ;;  %s916_s19 = smov 0  }
   0x4   :  { %s918_s20 = smov 0  }
   0x5 LB: > { %s701_s21 = sadd.s32 4294967295, %s872_s20   ;;  %s702_s22 = sadd.s32 4294967294, %s872_s20   ;;  %s872_s20 = sphi %s918_s20, %s21_s20   ;;  %s868_s19 = sphi %s916_s19, %s1087_s19   ;;  %s864_s18 = sphi %s914_s18, %s1086_s18  }
   0x6   : > { %s40_s23 = sadd.s32 1, %s868_s19  ;;  %p742_p2 = scmp.lt.s32.totalorder %s872_s20, 2 }
   0x7   : > { %p42_p1 = scmp.ge.s32.totalorder %s40_s23, 2  ;;  %p743_p3 = scmp.eq.s32.totalorder %s872_s20, 0 }
   0x8   : > { %s874_s25 = smov [#allocation7]   ;;  %s788_s29 = scalar_lea.hbm %s1076_s0, 256 }
   0x9   : > { %s1089_s23 = smov (%p42_p1, %s40_s23), 0  ;;  %p937_p4 = pnand %p743_p3, %p742_p2 }
   0xa   : > { %s237_s26 = sshll.u32 %s874_s25, 4  ;;  %p789_p6 = scmp.ne.s32.totalorder %s1076_s0, %s788_s29  ;;  %s238_s26 = int_to_ptr.vmem [resolvable:$true] %s237_s26 }
   0xb   : > { %p790_p7 = pneg %p937_p4  ;;  %p795_p10 = scmp.lt.u32.totalorder %s788_s29, %s1076_s0 }
   0xd   : > { %p791_p8 = pnand %p790_p7, %p789_p6 }
   0xf   : > { %p792_p9 = pneg %p791_p8 }
  0x11   : > { %p797_p11 = pnand %p795_p10, %p792_p9 }
  0x13   : > { %800 = shalt.err (!%p797_p11)
}
  0x14   : > { %s801_s9 = scalar_lea.vmem %s238_s26, 256  ;;  %s808_s10 = scalar_lea.vmem %s238_s26, 512 }
  0x15   : > { %p802_p12 = scmp.ne.s32.totalorder %s238_s26, %s801_s9  ;;  %p809_p2 = scmp.lt.s32.totalorder %s238_s26, %s238_s26 }
  0x16   : > { %p810_p3 = scmp.lt.s32.totalorder %s808_s10, %s801_s9 }
  0x17   : > { %p804_p13 = pnand %p802_p12, %p790_p7 }
  0x18   : > { %p811_p0 = por %p810_p3, %p809_p2 }
  0x19   : > { %p805_p1 = pneg %p804_p13 }
  0x1b   : > { %p812_p5 = pnand %p811_p0, %p805_p1 }
  0x1d   : > { %815 = shalt.err (!%p812_p5)
}
  0x1e   : > { %s875_s11 = smov 128   ;;  %s876_s12 = smov 8  }
  0x1f   : > { %737 = dma.hbm_to_vmem [thread:$0]  (!%p937_p4), %s1076_s0, 256, %s238_s26, [#allocation8], %s875_s11, %s875_s11, %s876_s12  }
  0x20   : > { %p245_p6 = scmp.lt.s32.totalorder %s872_s20, 3  ;;  %p1083_p8 = scmp.ge.s32.totalorder %s872_s20, 1 }
  0x22   : > { %p246_p7 = pnand %p1083_p8, %p245_p6 }
  0x23   : > { %p744_p9 = scmp.eq.s32.totalorder (!%p246_p7), %s701_s21, 0 }
  0x24   : > { %249 = sbr.rel (%p246_p7) target bundleno = 637 (0x27d), region = 40 }
  0x2b   : > { %855 = dma.done.wait (%p744_p9), [#allocation8], 256  }
  0x2c   : > { %857 = vsyncadd (%p744_p9), [#allocation8], 4294967040  ;;  %p292_p0 = scmp.eq.s32.totalorder %s864_s18, 0 }
  0x2d   : > { %vm298_vm0 = vcmask (%p292_p0), 3072   ;;  %v877_v0 = vmov (%p292_p0), 0.0  }
  0x2e   : > { %297 = sbr.rel (!%p292_p0) target bundleno = 53 (0x35), region = 48  ;;  %299 = vst.msk [vmem:[#allocation2] sm:$0xf] (%p292_p0), %vm298_vm0, %v877_v0  ;;  %300 = vst.msk [vmem:[#allocation3] sm:$0xf] (%p292_p0), %vm298_vm0, %v877_v0 }
  0x35 PF: > { %p709_p4 = scmp.ne.s32.totalorder %s864_s18, 0 }
  0x36   : > { %v304_v1 = vld [vmem:[#allocation7] sm:$0xff] (!%p709_p4)  ;;  %v305_v2 = vld [vmem:[#allocation7 + $0x8] sm:$0xff] (!%p709_p4) }
  0x37   : > { %303 = sbr.rel (%p709_p4) target bundleno = 62 (0x3e), region = 52  ;;  %309 = vst [vmem:[#allocation6] sm:$0xff] (!%p709_p4), %v304_v1  ;;  %310 = vst [vmem:[#allocation6 + $0x8] sm:$0xff] (!%p709_p4), %v305_v2 }
  0x3e PF: > { %v967_v3 = vld [vmem:[#allocation6] sm:$0xff]  ;;  %vm329_vm1 = vcmask 1043456   ;;  %v969_v4 = vld [vmem:[#allocation6 + $0x8] sm:$0xff]  ;;  %v878_v7 = vmov 0.0   ;;  %v316_v8 = vld [vmem:[%s1077_s1] sm:$0xf] }
  0x3f   : > { %v973_v5 = vcombine.high %v967_v3, %v967_v3  ;;  %v977_v6 = vcombine.high %v969_v4, %v969_v4  ;;  %398 = vmatprep.mubr.f32.mxu0 %v878_v7  ;;  %475 = vmatprep.mubr.f32.mxu1 %v878_v7  ;;  %vm325_vm2 = vcmask 31744   ;;  %v879_v9 = vmov 0   ;;  %v317_v10 = vld [vmem:[%s1078_s2] sm:$0xf]  ;;  %v517_v42 = vld [vmem:[#allocation3] sm:$0xf] (!%p709_p4) }
  0x40   : > { %782 = vset.pattern.permute.xlu0 %v879_v9  ;;  %v513_v37 = vld [vmem:[#allocation2] sm:$0xf] (!%p709_p4)  ;;  %vm515_vm3 = vcmask (!%p709_p4), 3072  }
  0x41   : > { %710 = vmatprep.subr.msk.mxu0 %vm329_vm1, %v973_v5  ;;  %713 = vmatprep.subr.msk.mxu1 %vm329_vm1, %v977_v6 }
  0x42   : > { %711 = vmatpush1.msk.msra.mxu0 %vm329_vm1, %v967_v3  ;;  %714 = vmatpush1.msk.msra.mxu1 %vm329_vm1, %v969_v4 }
  0x43   : > { %712 = vmatmul.mubr.msk.f32.vlgmr.msra.gmra.mrb[0].mxu0 %vm325_vm2, %v316_v8  ;;  %715 = vmatmul.mubr.msk.f32.vlgmr.msra.gmra.mrb[0].mxu1 %vm325_vm2, %v316_v8 }
  0x44   : > { %320 = vperm.xlu0 %782, %v317_v10  }
  0xc3   : > { %v321_v11 = vpop.permute.xlu0 %320 }
 0x112   : > { %484 = sbr.rel (%p709_p4) target bundleno = 436 (0x1b4), region = 56 }
 0x116   : > { %v400_v12 = vpop.f32.mrb[0].mxu0  ;;  %v477_v13 = vpop.f32.mrb[0].mxu1 }
 0x117   : > { %v993_v14 = vadd.f32 %v400_v12, %v321_v11  ;;  %v995_v15 = vadd.f32 %v477_v13, %v321_v11  ;;  %v402_v16 = vpop.f32.mrb[1].mxu0  ;;  %v479_v17 = vpop.f32.mrb[1].mxu1 }
 0x118   : > { %v997_v18 = vadd.f32 %v402_v16, %v321_v11  ;;  %v999_v19 = vadd.f32 %v479_v17, %v321_v11 }
 0x119   : > { %v499_v20 = vsel %vm329_vm1, %v995_v15, 0.0  ;;  %v485_v22 = vsel %vm329_vm1, %v993_v14, 0.0  ;;  %v505_v26 = vmul.f32 %v995_v15, %v995_v15  ;;  %v491_v28 = vmul.f32 %v993_v14, %v993_v14 }
 0x11a   : > { %v500_v21 = vsel %vm329_vm1, %v999_v19, 0.0  ;;  %v486_v23 = vsel %vm329_vm1, %v997_v18, 0.0  ;;  %v506_v27 = vmul.f32 %v999_v19, %v999_v19  ;;  %v492_v29 = vmul.f32 %v997_v18, %v997_v18 }
 0x11b   : > { %v501_v24 = vadd.f32 %v500_v21, %v499_v20  ;;  %v487_v25 = vadd.f32 %v486_v23, %v485_v22  ;;  %v507_v30 = vsel %vm329_vm1, %v505_v26, 0.0  ;;  %v493_v33 = vsel %vm329_vm1, %v491_v28, 0.0 }
 0x11c   : > { %v508_v31 = vsel %vm329_vm1, %v506_v27, 0.0  ;;  %v494_v34 = vsel %vm329_vm1, %v492_v29, 0.0 }
 0x11d   : > { %502 = vadd.xlane.f32.xlu1 %v501_v24  ;;  %488 = vadd.xlane.f32.xlu0 %v487_v25  ;;  %v509_v32 = vadd.f32 %v508_v31, %v507_v30  ;;  %v495_v35 = vadd.f32 %v494_v34, %v493_v33 }
 0x121   : > { %510 = vadd.xlane.f32.xlu1 %v509_v32  ;;  %496 = vadd.xlane.f32.xlu0 %v495_v35 }
 0x1aa   : > { %v503_v36 = vpop.xlane.xlu1 %502  ;;  %v489_v38 = vpop.xlane.xlu0 %488 }
 0x1ab   : > { %v504_v39 = vadd.f32 %v503_v36, %v489_v38 }
 0x1ad   : > { %v514_v40 = vadd.f32 %v513_v37, %v504_v39 }
 0x1ae   : > { %v511_v41 = vpop.xlane.xlu1 %510  ;;  %v497_v43 = vpop.xlane.xlu0 %496 }
 0x1af   : > { %516 = vst.msk [vmem:[#allocation2] sm:$0xf] %vm515_vm3, %v514_v40  ;;  %v512_v44 = vadd.f32 %v511_v41, %v497_v43 }
 0x1b1   : > { %v518_v45 = vadd.f32 %v517_v42, %v512_v44 }
 0x1b3   : > { %519 = vst.msk [vmem:[#allocation3] sm:$0xf] %vm515_vm3, %v518_v45 }
 0x1b4 PF: > { %p520_p5 = scmp.eq.s32.totalorder %s864_s18, 1 }
 0x1b5   : > { %v532_v54 = vld [vmem:[%s1079_s3] sm:$0xf] (%p520_p5)  ;;  %vm536_vm4 = vcmask (%p520_p5), 3072  }
 0x1b6   : > { %524 = sbr.rel (!%p520_p5) target bundleno = 469 (0x1d5), region = 60  ;;  %v525_v46 = vld [vmem:[#allocation2] sm:$0xf] (%p520_p5) }
 0x1b7   : > { %v526_v48 = vmul.f32 (%p520_p5), 0.001953125, %v525_v46  ;;  %v538_v57 = vld [vmem:[%s1080_s4] sm:$0xf] (%p520_p5) }
 0x1b9   : > { %v529_v50 = vmul.f32 (%p520_p5), %v526_v48, %v526_v48 }
 0x1ba   : > { %v527_v47 = vld [vmem:[#allocation3] sm:$0xf] (%p520_p5) }
 0x1bb   : > { %v528_v49 = vmul.f32 (%p520_p5), 0.001953125, %v527_v47 }
 0x1bd   : > { %v530_v51 = vsub.f32 %v528_v49, %v529_v50 }
 0x1bf   : > { %v531_v52 = vmax.f32 %v530_v51, 0.0 }
 0x1c1   : > { %v533_v53 = vadd.f32 1e-05, %v531_v52 }
 0x1c3   : > { %785 = vrsqrt.f32 %v533_v53 }
 0x1cd   : > { %v786_v55 = vpop.eup %785 }
 0x1ce   : > { %v535_v56 = vmul.f32 %v786_v55, %v532_v54 }
 0x1d0   : > { %537 = vst.msk [vmem:[#allocation4] sm:$0xf] %vm536_vm4, %v535_v56  ;;  %v539_v58 = vmul.f32 %v535_v56, %v526_v48 }
 0x1d2   : > { %v540_v59 = vsub.f32 %v538_v57, %v539_v58 }
 0x1d4   : > { %541 = vst.msk [vmem:[#allocation5] sm:$0xf] %vm536_vm4, %v540_v59 }
 0x1d5 PF: > { %p718_p10 = scmp.ne.s32.totalorder %s864_s18, 1 }
 0x1d6   : > { %v880_v61 = vmov (!%p718_p10), 0  }
 0x1d7   : > { %544 = sbr.rel (%p718_p10) target bundleno = 613 (0x265), region = 64  ;;  %v545_v60 = vld [vmem:[#allocation4] sm:$0xf] (!%p718_p10)  ;;  %787 = vset.pattern.permute.xlu0 (!%p718_p10), %v880_v61 }
 0x1d8   : > { %549 = vperm.xlu0 (!%p718_p10), %787, %v545_v60  }
 0x1db   : > { %v546_v62 = vld [vmem:[#allocation5] sm:$0xf] (!%p718_p10) }
 0x1dc   : > { %556 = vperm.xlu0 (!%p718_p10), %787, %v546_v62  }
 0x257   : > { %v550_v63 = vpop.permute.xlu0 %549 }
 0x258   : > { %v552_v0 = vmul.f32 %v550_v63, %v993_v14  ;;  %v553_v1 = vmul.f32 %v550_v63, %v997_v18  ;;  %v571_v2 = vmul.f32 %v550_v63, %v995_v15  ;;  %v572_v7 = vmul.f32 %v550_v63, %v999_v19 }
 0x25b   : > { %v557_v8 = vpop.permute.xlu0 %556 }
 0x25c   : > { %v559_v9 = vadd.f32 %v557_v8, %v552_v0  ;;  %v560_v10 = vadd.f32 %v557_v8, %v553_v1  ;;  %v573_v11 = vadd.f32 %v571_v2, %v557_v8  ;;  %v574_v12 = vadd.f32 %v572_v7, %v557_v8 }
 0x25e   : > { %v562_v13 = vadd.f32 %v559_v9, %v967_v3  ;;  %v563_v16 = vadd.f32 %v560_v10, %v973_v5  ;;  %v576_v17 = vadd.f32 %v573_v11, %v969_v4  ;;  %v577_v20 = vadd.f32 %v574_v12, %v977_v6 }
 0x260   : > { %v564_v14 = vmax.f32 %v562_v13, 0.0  ;;  %v565_v21 = vmax.f32 %v563_v16, 0.0  ;;  %v578_v18 = vmax.f32 %v576_v17, 0.0  ;;  %v579_v22 = vmax.f32 %v577_v20, 0.0 }
 0x262   : > { %v568_v15 = vcombine.low %v564_v14, %v565_v21  ;;  %v582_v23 = vcombine.low %v578_v18, %v579_v22 }
 0x264   : > { %570 = vst [vmem:[#allocation10] sm:$0xff] %v568_v15  ;;  %719 = vst [vmem:[#allocation10 + $0x8] sm:$0xff] %v582_v23 }
 0x265 PF: > { %p1041_p11 = scmp.eq.s32.totalorder %s701_s21, 1  ;;  %s881_s29 = smov [#allocation10]  }
 0x266   : > { %s605_s30 = sshll.u32 %s881_s29, 4  ;;  %s606_s30 = int_to_ptr.vmem [resolvable:$true] %s605_s30 }
 0x267   : > { %s816_s6 = scalar_lea.vmem %s606_s30, 256  ;;  %s822_s7 = scalar_lea.vmem %s606_s30, 512 }
 0x268   : > { %p817_p12 = scmp.ne.s32.totalorder %s606_s30, %s816_s6  ;;  %p823_p2 = scmp.lt.s32.totalorder %s606_s30, %s606_s30 }
 0x269   : > { %p824_p3 = scmp.lt.s32.totalorder %s822_s7, %s816_s6 }
 0x26a   : > { %p818_p13 = pnand %p817_p12, %p1041_p11 }
 0x26b   : > { %p825_p6 = por %p824_p3, %p823_p2 }
 0x26c   : > { %p819_p1 = pneg %p818_p13 }
 0x26e   : > { %p826_p8 = pnand %p825_p6, %p819_p1 }
 0x270   : > { %829 = shalt.err (!%p826_p8)
}
 0x271   : > { %s830_s9 = scalar_lea.hbm %s1081_s5, 256 }
 0x272   : > { %p831_p7 = scmp.ne.s32.totalorder %s1081_s5, %s830_s9  ;;  %p836_p4 = scmp.lt.u32.totalorder %s830_s9, %s1081_s5 }
 0x274   : > { %p832_p9 = pnand %p831_p7, %p1041_p11 }
 0x276   : > { %p833_p0 = pneg %p832_p9 }
 0x278   : > { %p838_p5 = pnand %p836_p4, %p833_p0 }
 0x27a   : > { %841 = shalt.err (!%p838_p5)
}
 0x27b   : > { %s882_s14 = smov 128   ;;  %s883_s15 = smov 8  }
 0x27c   : > { %731 = dma.vmem_to_hbm [thread:$0]  (%p1041_p11), %s606_s30, 256, %s1081_s5, [#allocation9], %s882_s14, %s882_s14, %s883_s15  }
 0x27d PF: > { %p747_p10 = scmp.eq.s32.totalorder %s702_s22, 1  ;;  %p1085_p12 = scmp.ge.s32.totalorder %s872_s20, 2 }
 0x27f   : > { %p739_p13 = pnand %p747_p10, %p1085_p12 }
 0x281   : > { %859 = dma.done.wait (!%p739_p13), [#allocation9], 256  }
 0x282   : > { %861 = vsyncadd (!%p739_p13), [#allocation9], 4294967040  ;;  %s21_s20 = sadd.s32 1, %s872_s20   ;;  %s1086_s18 = smov %s868_s19 }
 0x283   : > { %p18_p1 = scmp.ge.s32.totalorder %s21_s20, 4   ;;  %s1087_s19 = smov %s1089_s23 }
 0x285   :  { %20 = sbr.rel (!%p18_p1) target bundleno = 5 (0x5), region = 108 }
 0x28c   :  { %626 = vsyncpa [#allocation8], 1 }
 0x28d   :  { %628 = vsyncpa [#allocation8 + $0x1], 1 }
 0x28e   :  { %629 = vsyncpa [#allocation9], 1 }
 0x28f   :  { %631 = vsyncpa [#allocation9 + $0x1], 1 }

</bundles_post_ra>
